<compile_context>
chip_gen: v5e
topology: v5e:2x2
jax: 0.10.0
libtpu: 0.0.40
codegen_flags: <defaults>
</compile_context>

<pallas_src>
import jax
import jax.numpy as jnp
from jax import lax
from jax.experimental import pallas as pl
from jax.experimental.pallas import tpu as pltpu


def value_net_kernel(x_ref, w1_ref, b1_ref, w2_ref, b2_ref, w3_ref, b3_ref, o_ref):
    x = x_ref[...]                                                    # (tile, S)
    # Layer 1: (tile, S) @ (S, H1p) on the MXU; bias + ReLU in f32 on the VPU.
    h = jnp.dot(x, w1_ref[...], preferred_element_type=jnp.float32)  # (tile, H1p)
    h = jnp.maximum(h + b1_ref[...], 0.0)
    # Layer 2: (tile, H1p) @ (H1p, H2p).  Cast back to the MXU dtype if bf16.
    h = jnp.dot(h.astype(w2_ref.dtype), w2_ref[...],
                preferred_element_type=jnp.float32)                   # (tile, H2p)
    h = jnp.maximum(h + b2_ref[...], 0.0)
    # Value head: w3 lives in row 0 of an (8, H2p) block (rows 1..7 are zero).
    # Contracting its lane dim against h's lane dim (q @ k^T style dot_general)
    # both reduces and emits the result as lane-dense rows (8, tile) -- no
    # (tile, 1) masked-column stores and no explicit relayout.  f32 throughout.
    v = lax.dot_general(w3_ref[...], h, (((1,), (1,)), ((), ())),
                        preferred_element_type=jnp.float32)           # (8, tile)
    o_ref[0] = (v[0:1, :] + b3_ref[0, 0]).astype(o_ref.dtype)         # (1, tile)


def _round_up(n, m):
    return ((n + m - 1) // m) * m


def value_network(x, params, *, batch_tile=4096, mxu_dtype=None):
    """x: [B, state_dim].  params: w1,b1,w2,b2,w3,b3 with [in, out] weights.

    mxu_dtype: optional dtype (e.g. jnp.bfloat16) for the x/w1/w2 MXU inputs;
    accumulation, biases, ReLU and the value head stay float32.
    """
    B, state_dim = x.shape
    w1, b1, w2, b2, w3, b3 = (params[k] for k in ("w1", "b1", "w2", "b2", "w3", "b3"))
    h1, h2 = w1.shape[1], w2.shape[1]
    out_dtype = x.dtype
    mm_dtype = mxu_dtype if mxu_dtype is not None else x.dtype

    LANE = 128
    h1p, h2p = _round_up(h1, LANE), _round_up(h2, LANE)

    # Zero-pad hidden widths to full 128-lane vregs (padded lanes get zero bias,
    # stay exactly 0 through ReLU, and padded w2 rows / w3 lanes contribute 0).
    w1p = jnp.pad(w1, ((0, 0), (0, h1p - h1))).astype(mm_dtype)
    b1p = jnp.pad(b1.reshape(1, h1), ((0, 0), (0, h1p - h1))).astype(jnp.float32)
    w2p = jnp.pad(w2, ((0, h1p - h1), (0, h2p - h2))).astype(mm_dtype)
    b2p = jnp.pad(b2.reshape(1, h2), ((0, 0), (0, h2p - h2))).astype(jnp.float32)
    # Head weights: row 0 of an (8, H2p) block (full sublane tile), kept f32.
    w3blk = jnp.pad(w3.reshape(1, h2).astype(jnp.float32), ((0, 7), (0, h2p - h2)))
    b3s = b3.reshape(1, 1).astype(jnp.float32)

    # Batch tiling: pad B up to grid*tile.  tile is capped at batch_tile and
    # rounded to 128 rows.  For non-trivial batches force an even grid of >= 2
    # steps (v7x dual-TensorCore balance).  Never use a whole-batch block.
    n_steps = max(1, -(-B // batch_tile))
    if B >= 2 * LANE:
        n_steps = max(n_steps, 2)
        n_steps += n_steps % 2
    tile = _round_up(-(-B // n_steps), LANE)
    b_pad = tile * n_steps

    xk = x
    if b_pad != B:
        xk = jnp.pad(xk, ((0, b_pad - B), (0, 0)))
    if xk.dtype != mm_dtype:
        xk = xk.astype(mm_dtype)       # fused with the pad by XLA

    def full(shape):
        return pl.BlockSpec(shape, lambda i: (0,) * len(shape))

    out = pl.pallas_call(
        value_net_kernel,
        out_shape=jax.ShapeDtypeStruct((n_steps, 1, tile), out_dtype),
        grid_spec=pltpu.PrefetchScalarGridSpec(
            num_scalar_prefetch=0,
            grid=(n_steps,),
            in_specs=[
                pl.BlockSpec((tile, state_dim), lambda i: (i, 0)),   # x tile (streams)
                full((state_dim, h1p)),                              # w1 (resident)
                full((1, h1p)),                                      # b1
                full((h1p, h2p)),                                    # w2
                full((1, h2p)),                                      # b2
                full((8, h2p)),                                      # w3 block
                pl.BlockSpec(memory_space=pltpu.MemorySpace.SMEM),   # b3 scalar
            ],
            out_specs=pl.BlockSpec((1, 1, tile), lambda i: (i, 0, 0)),
        ),
        compiler_params=pltpu.CompilerParams(
            dimension_semantics=("parallel",)),
    )(xk, w1p, b1p, w2p, b2p, w3blk, b3s)

    # (grid, 1, tile) flattens contiguously in batch order; drop the padding.
    return out.reshape(-1)[:B].reshape(B, 1)


def init_params(key, state_dim, hidden_sizes=(64, 64)):
    """Deterministic synthetic init (Kaiming-uniform-like), weights stored [in, out]."""
    h1, h2 = hidden_sizes
    dims = [(state_dim, h1), (h1, h2), (h2, 1)]
    params = {}
    keys = jax.random.split(key, 2 * len(dims))
    for idx, (din, dout) in enumerate(dims):
        bound = 1.0 / jnp.sqrt(din)
        w = jax.random.uniform(keys[2 * idx], (din, dout), jnp.float32, -bound, bound)
        b = jax.random.uniform(keys[2 * idx + 1], (1, dout), jnp.float32, -bound, bound)
        params[f"w{idx + 1}"] = w
        params[f"b{idx + 1}"] = b
    return params


def value_network_ref(x, params):
    h = jnp.maximum(x @ params["w1"] + params["b1"], 0.0)
    h = jnp.maximum(h @ params["w2"] + params["b2"], 0.0)
    return h @ params["w3"] + params["b3"]


if __name__ == "__main__":
    key = jax.random.PRNGKey(0)
    k_x, k_p, k_x2 = jax.random.split(key, 3)

    state_dim = 16
    hidden_sizes = (64, 64)          # module default hidden_sizes
    params = init_params(k_p, state_dim, hidden_sizes)

    # Small batch (single padded tile, grid of 1).
    x_small = jax.random.normal(k_x, (16, state_dim), dtype=jnp.float32)
    out_small = jax.block_until_ready(value_network(x_small, params))
    ref_small = value_network_ref(x_small, params)
    assert out_small.shape == (16, 1), out_small.shape
    assert jnp.allclose(out_small, ref_small, atol=1e-4, rtol=1e-4), "f32 small mismatch"

    # Ragged batch: padded to 2 x 512-row tiles, multi-step grid, padding sliced off.
    x_big = jax.random.normal(k_x2, (1000, state_dim), dtype=jnp.float32)
    out_big = jax.block_until_ready(value_network(x_big, params))
    ref_big = value_network_ref(x_big, params)
    assert out_big.shape == (1000, 1), out_big.shape
    assert jnp.allclose(out_big, ref_big, atol=1e-4, rtol=1e-4), "f32 ragged mismatch"

    # Optional bf16 MXU inputs (f32 accumulation) - looser tolerance vs f32 ref.
    out_bf16 = jax.block_until_ready(
        value_network(x_big, params, mxu_dtype=jnp.bfloat16))
    assert out_bf16.shape == (1000, 1), out_bf16.shape
    assert jnp.allclose(out_bf16, ref_big, atol=1e-1, rtol=1e-1), "bf16 mismatch"

    print("KERNEL_OK")
</pallas_src>

<mosaic_0001>
module attributes {stable_mosaic.version = 11 : i64} {
  func.func @value_net_kernel(%arg0: i32, %arg1: memref<128x16xf32, #tpu.memory_space<vmem>>, %arg2: memref<16x128xf32, #tpu.memory_space<vmem>>, %arg3: memref<1x128xf32, #tpu.memory_space<vmem>>, %arg4: memref<128x128xf32, #tpu.memory_space<vmem>>, %arg5: memref<1x128xf32, #tpu.memory_space<vmem>>, %arg6: memref<8x128xf32, #tpu.memory_space<vmem>>, %arg7: memref<1x1xf32, #tpu.memory_space<smem>>, %arg8: memref<1x1x128xf32, #tpu.memory_space<vmem>>) attributes {dimension_semantics = [#tpu.dimension_semantics<parallel>], iteration_bounds = array<i64: 1>, scalar_prefetch = 0 : i64, scratch_operands = 0 : i64, tpu.core_type = #tpu.core_type<tc>, window_params = [{transform_indices = @transform_0, window_bounds = array<i64: 128, 16>}, {pipeline_mode = #tpu.pipeline_mode<synchronous>, transform_indices = @transform_1, window_bounds = array<i64: 16, 128>}, {pipeline_mode = #tpu.pipeline_mode<synchronous>, transform_indices = @transform_2, window_bounds = array<i64: 1, 128>}, {pipeline_mode = #tpu.pipeline_mode<synchronous>, transform_indices = @transform_3, window_bounds = array<i64: 128, 128>}, {pipeline_mode = #tpu.pipeline_mode<synchronous>, transform_indices = @transform_4, window_bounds = array<i64: 1, 128>}, {pipeline_mode = #tpu.pipeline_mode<synchronous>, transform_indices = @transform_5, window_bounds = array<i64: 8, 128>}, {transform_indices = @transform_6, window_bounds = array<i64: 1, 1>}, {transform_indices = @transform_7, window_bounds = array<i64: 1, 1, 128>}]} {
    %c0 = arith.constant 0 : index
    %c0_0 = arith.constant 0 : index
    %0 = vector.load %arg1[%c0, %c0_0] : memref<128x16xf32, #tpu.memory_space<vmem>>, vector<128x16xf32>
    %c0_1 = arith.constant 0 : index
    %c0_2 = arith.constant 0 : index
    %1 = vector.load %arg2[%c0_1, %c0_2] : memref<16x128xf32, #tpu.memory_space<vmem>>, vector<16x128xf32>
    %cst = arith.constant dense<0.000000e+00> : vector<128x128xf32>
    %2 = tpu.matmul %0, %1, %cst {dimension_numbers = #tpu.dot_dimension_numbers<[1], [0], [0], [1], [0, 0, 1, 1], [], []>} : vector<128x16xf32>, vector<16x128xf32>, vector<128x128xf32> -> vector<128x128xf32>
    %c0_3 = arith.constant 0 : index
    %c0_4 = arith.constant 0 : index
    %3 = vector.load %arg3[%c0_3, %c0_4] : memref<1x128xf32, #tpu.memory_space<vmem>>, vector<1x128xf32>
    %4 = vector.broadcast %3 : vector<1x128xf32> to vector<128x128xf32>
    %5 = arith.addf %2, %4 : vector<128x128xf32>
    %cst_5 = arith.constant 0.000000e+00 : f32
    %6 = vector.broadcast %cst_5 : f32 to vector<128x128xf32>
    %7 = arith.maximumf %5, %6 : vector<128x128xf32>
    %c0_6 = arith.constant 0 : index
    %c0_7 = arith.constant 0 : index
    %8 = vector.load %arg4[%c0_6, %c0_7] : memref<128x128xf32, #tpu.memory_space<vmem>>, vector<128x128xf32>
    %cst_8 = arith.constant dense<0.000000e+00> : vector<128x128xf32>
    %9 = tpu.matmul %7, %8, %cst_8 {dimension_numbers = #tpu.dot_dimension_numbers<[1], [0], [0], [1], [0, 0, 1, 1], [], []>} : vector<128x128xf32>, vector<128x128xf32>, vector<128x128xf32> -> vector<128x128xf32>
    %c0_9 = arith.constant 0 : index
    %c0_10 = arith.constant 0 : index
    %10 = vector.load %arg5[%c0_9, %c0_10] : memref<1x128xf32, #tpu.memory_space<vmem>>, vector<1x128xf32>
    %11 = vector.broadcast %10 : vector<1x128xf32> to vector<128x128xf32>
    %12 = arith.addf %9, %11 : vector<128x128xf32>
    %cst_11 = arith.constant 0.000000e+00 : f32
    %13 = vector.broadcast %cst_11 : f32 to vector<128x128xf32>
    %14 = arith.maximumf %12, %13 : vector<128x128xf32>
    %c0_12 = arith.constant 0 : index
    %c0_13 = arith.constant 0 : index
    %15 = vector.load %arg6[%c0_12, %c0_13] : memref<8x128xf32, #tpu.memory_space<vmem>>, vector<8x128xf32>
    %cst_14 = arith.constant dense<0.000000e+00> : vector<8x128xf32>
    %16 = tpu.matmul %15, %14, %cst_14 {dimension_numbers = #tpu.dot_dimension_numbers<[1], [1], [0], [0], [0, 0, 1, 0], [], []>} : vector<8x128xf32>, vector<128x128xf32>, vector<8x128xf32> -> vector<8x128xf32>
    %17 = vector.extract_strided_slice %16 {offsets = [0, 0], sizes = [1, 128], strides = [1, 1]} : vector<8x128xf32> to vector<1x128xf32>
    %c0_15 = arith.constant 0 : index
    %c0_16 = arith.constant 0 : index
    %18 = memref.load %arg7[%c0_15, %c0_16] : memref<1x1xf32, #tpu.memory_space<smem>>
    %19 = vector.broadcast %18 : f32 to vector<1x128xf32>
    %20 = arith.addf %17, %19 : vector<1x128xf32>
    %c0_17 = arith.constant 0 : index
    %c0_18 = arith.constant 0 : index
    %c0_19 = arith.constant 0 : index
    %21 = vector.load %arg8[%c0_17, %c0_18, %c0_19] : memref<1x1x128xf32, #tpu.memory_space<vmem>>, vector<1x1x128xf32>
    %22 = vector.shape_cast %21 : vector<1x1x128xf32> to vector<1x128xf32>
    %23 = vector.shape_cast %20 : vector<1x128xf32> to vector<1x1x128xf32>
    tpu.vector_store %arg8[%c0_17, %c0_18, %c0_19], %23 {strides = array<i32>} : memref<1x1x128xf32, #tpu.memory_space<vmem>>, vector<1x1x128xf32>,
    return
  }
  func.func @transform_0(%arg0: i32) -> (i32, i32) {
    %c0_i32 = arith.constant 0 : i32
    %c0_i32_0 = arith.constant 0 : i32
    return %arg0, %c0_i32 : i32, i32
  }
  func.func @transform_1(%arg0: i32) -> (i32, i32) {
    %c0_i32 = arith.constant 0 : i32
    %c0_i32_0 = arith.constant 0 : i32
    %c0_i32_1 = arith.constant 0 : i32
    return %c0_i32, %c0_i32_0 : i32, i32
  }
  func.func @transform_2(%arg0: i32) -> (i32, i32) {
    %c0_i32 = arith.constant 0 : i32
    %c0_i32_0 = arith.constant 0 : i32
    %c0_i32_1 = arith.constant 0 : i32
    return %c0_i32, %c0_i32_0 : i32, i32
  }
  func.func @transform_3(%arg0: i32) -> (i32, i32) {
    %c0_i32 = arith.constant 0 : i32
    %c0_i32_0 = arith.constant 0 : i32
    %c0_i32_1 = arith.constant 0 : i32
    return %c0_i32, %c0_i32_0 : i32, i32
  }
  func.func @transform_4(%arg0: i32) -> (i32, i32) {
    %c0_i32 = arith.constant 0 : i32
    %c0_i32_0 = arith.constant 0 : i32
    %c0_i32_1 = arith.constant 0 : i32
    return %c0_i32, %c0_i32_0 : i32, i32
  }
  func.func @transform_5(%arg0: i32) -> (i32, i32) {
    %c0_i32 = arith.constant 0 : i32
    %c0_i32_0 = arith.constant 0 : i32
    %c0_i32_1 = arith.constant 0 : i32
    return %c0_i32, %c0_i32_0 : i32, i32
  }
  func.func @transform_6(%arg0: i32) -> (i32, i32) {
    %c0_i32 = arith.constant 0 : i32
    %c0_i32_0 = arith.constant 0 : i32
    %c0_i32_1 = arith.constant 0 : i32
    return %c0_i32, %c0_i32_0 : i32, i32
  }
  func.func @transform_7(%arg0: i32) -> (i32, i32, i32) {
    %c0_i32 = arith.constant 0 : i32
    %c0_i32_0 = arith.constant 0 : i32
    %c0_i32_1 = arith.constant 0 : i32
    return %arg0, %c0_i32, %c0_i32_0 : i32, i32, i32
  }
}

</mosaic_0001>

<bundles_post_ra>
// kernel: tpu_custom_call.1
= control target key start
LH: loop header
LB: loop body
LE: loop exit
PB: predicated region body
PF: predicated region fallthrough
CT: control target
= control target key end

     0   :  { %13 = vsyncpa [#allocation4], 0  ;;  %s600_s0 = inlined_call_operand.vmem [shape: f32[128,16], index: 0, kind: input, shape index: {}]   ;;  %s601_s1 = inlined_call_operand.vmem [shape: f32[16,128], index: 1, kind: input, shape index: {}]   ;;  %s602_s2 = inlined_call_operand.vmem [shape: f32[1,128], index: 2, kind: input, shape index: {}]   ;;  %s603_s3 = inlined_call_operand.vmem [shape: f32[128,128], index: 3, kind: input, shape index: {}]   ;;  %s604_s4 = inlined_call_operand.vmem [shape: f32[1,128], index: 4, kind: input, shape index: {}]   ;;  %s605_s5 = inlined_call_operand.hbm [shape: f32[8,128], index: 5, kind: input, shape index: {}]   ;;  %s606_s6 = inlined_call_operand.<no memory space> [shape: f32[1,1], index: 6, kind: input, shape index: {}]   ;;  %s607_s7 = inlined_call_operand.hbm [shape: f32[1,1,128], index: 7, kind: output, shape index: {}]  }
   0x1   :  { %14 = vsyncpa [#allocation5], 0  ;;  %s30_s26 = sshll.u32 %s605_s5, 4  ;;  %s425_s27 = smov [#allocation3]   ;;  %s31_s26 = int_to_ptr.hbm [resolvable:$true] %s30_s26 }
   0x2   :  { %s32_s28 = sshll.u32 %s425_s27, 4  ;;  %s33_s28 = int_to_ptr.vmem [resolvable:$true] %s32_s28 }
   0x3   :  { %35 = dma.hbm_to_vmem [thread:$0]  %s31_s26, 128, %s33_s28, [#allocation4]  }
   0x4   :  { %421 = dma.done.wait [#allocation4], 128  }
   0x5   :  { %422 = vsyncadd [#allocation4], 4294967168  ;;  %v59_v0 = vld [vmem:[%s601_s1 + $0x8] sm:$0xff]  ;;  %v58_v1 = vld [vmem:[%s601_s1] sm:$0xff]  ;;  %vm64_vm0 = vcmask 130048   ;;  %s426_s24 = smov [#allocation6]  }
   0x6   :  { %127 = vmatpush.msra.mxu0 %v59_v0  ;;  %v42_v2 = vld [vmem:[%s600_s0] sm:$0xff]  ;;  %v43_v3 = vld [vmem:[%s600_s0 + $0x8] sm:$0xff]  ;;  %v44_v4 = vld [vmem:[%s600_s0 + $0x10] sm:$0xff]  ;;  %s325_s25 = sshll.u32 %s426_s24, 4  ;;  %s327_s28 = sshll.u32 %s607_s7, 4  ;;  %s326_s25 = int_to_ptr.vmem [resolvable:$true] %s325_s25  ;;  %s328_s28 = int_to_ptr.hbm [resolvable:$true] %s327_s28 }
   0x7   :  { %v45_v5 = vld [vmem:[%s600_s0 + $0x18] sm:$0xff]  ;;  %v46_v6 = vld [vmem:[%s600_s0 + $0x20] sm:$0xff]  ;;  %v47_v7 = vld [vmem:[%s600_s0 + $0x28] sm:$0xff] }
   0x8   :  { %128 = vmatpush.msra.mxu0 %v58_v1  ;;  %v48_v8 = vld [vmem:[%s600_s0 + $0x30] sm:$0xff]  ;;  %v49_v9 = vld [vmem:[%s600_s0 + $0x38] sm:$0xff]  ;;  %v50_v10 = vld [vmem:[%s600_s0 + $0x40] sm:$0xff] }
   0x9   :  { %337 = vmatmul.msk.f32.vlgmr.msra.gmra.mxu0 %vm64_vm0, %v42_v2  ;;  %v209_v11 = vld [vmem:[%s603_s3 + $0x78] sm:$0xff]  ;;  %v208_v12 = vld [vmem:[%s603_s3 + $0x70] sm:$0xff]  ;;  %v207_v13 = vld [vmem:[%s603_s3 + $0x68] sm:$0xff] }
   0xa   :  { %214 = vmatpush.msra.mxu1 %v209_v11  ;;  %353 = vmatpush.msra.mxu3 %v209_v11  ;;  %v51_v14 = vld [vmem:[%s600_s0 + $0x48] sm:$0xff]  ;;  %v206_v15 = vld [vmem:[%s603_s3 + $0x60] sm:$0xff]  ;;  %v205_v16 = vld [vmem:[%s603_s3 + $0x58] sm:$0xff] }
   0xb   :  { %v204_v17 = vld [vmem:[%s603_s3 + $0x50] sm:$0xff]  ;;  %v203_v18 = vld [vmem:[%s603_s3 + $0x48] sm:$0xff]  ;;  %v202_v20 = vld [vmem:[%s603_s3 + $0x40] sm:$0xff] }
   0xc   :  { %215 = vmatpush.msra.mxu1 %v208_v12  ;;  %354 = vmatpush.msra.mxu3 %v208_v12  ;;  %v52_v19 = vld [vmem:[%s600_s0 + $0x50] sm:$0xff]  ;;  %v201_v21 = vld [vmem:[%s603_s3 + $0x38] sm:$0xff]  ;;  %v199_v23 = vld [vmem:[%s603_s3 + $0x28] sm:$0xff] }
   0xd   :  { %v200_v22 = vld [vmem:[%s603_s3 + $0x30] sm:$0xff]  ;;  %v53_v24 = vld [vmem:[%s600_s0 + $0x58] sm:$0xff]  ;;  %v198_v25 = vld [vmem:[%s603_s3 + $0x20] sm:$0xff] }
   0xe   :  { %216 = vmatpush.msra.mxu1 %v207_v13  ;;  %355 = vmatpush.msra.mxu3 %v207_v13  ;;  %v197_v26 = vld [vmem:[%s603_s3 + $0x18] sm:$0xff]  ;;  %v196_v27 = vld [vmem:[%s603_s3 + $0x10] sm:$0xff]  ;;  %v54_v28 = vld [vmem:[%s600_s0 + $0x60] sm:$0xff] }
   0xf   :  { %v195_v29 = vld [vmem:[%s603_s3 + $0x8] sm:$0xff]  ;;  %v194_v30 = vld [vmem:[%s603_s3] sm:$0xff]  ;;  %v56_v32 = vld [vmem:[%s600_s0 + $0x70] sm:$0xff] }
  0x10   :  { %217 = vmatpush.msra.mxu1 %v206_v15  ;;  %356 = vmatpush.msra.mxu3 %v206_v15  ;;  %v55_v31 = vld [vmem:[%s600_s0 + $0x68] sm:$0xff]  ;;  %v57_v33 = vld [vmem:[%s600_s0 + $0x78] sm:$0xff]  ;;  %v371_v34 = vld [vmem:[%s602_s2] ss:$0 sm:$0xff] }
  0x11   :  { %338 = vmatmul.msk.f32.gmra.mxu0 %vm64_vm0, %v43_v3 }
  0x12   :  { %218 = vmatpush.msra.mxu1 %v205_v16  ;;  %357 = vmatpush.msra.mxu3 %v205_v16 }
  0x14   :  { %219 = vmatpush.msra.mxu1 %v204_v17  ;;  %358 = vmatpush.msra.mxu3 %v204_v17 }
  0x16   :  { %220 = vmatpush.msra.mxu1 %v203_v18  ;;  %359 = vmatpush.msra.mxu3 %v203_v18 }
  0x18   :  { %221 = vmatpush.msra.mxu1 %v202_v20  ;;  %360 = vmatpush.msra.mxu3 %v202_v20 }
  0x19   :  { %339 = vmatmul.msk.f32.gmra.mxu0 %vm64_vm0, %v44_v4 }
  0x1a   :  { %222 = vmatpush.msra.mxu1 %v201_v21  ;;  %361 = vmatpush.msra.mxu3 %v201_v21 }
  0x1c   :  { %223 = vmatpush.msra.mxu1 %v200_v22  ;;  %362 = vmatpush.msra.mxu3 %v200_v22 }
  0x1e   :  { %224 = vmatpush.msra.mxu1 %v199_v23  ;;  %363 = vmatpush.msra.mxu3 %v199_v23 }
  0x20   :  { %225 = vmatpush.msra.mxu1 %v198_v25  ;;  %364 = vmatpush.msra.mxu3 %v198_v25 }
  0x21   :  { %340 = vmatmul.msk.f32.gmra.mxu0 %vm64_vm0, %v45_v5 }
  0x22   :  { %226 = vmatpush.msra.mxu1 %v197_v26  ;;  %365 = vmatpush.msra.mxu3 %v197_v26 }
  0x24   :  { %227 = vmatpush.msra.mxu1 %v196_v27  ;;  %366 = vmatpush.msra.mxu3 %v196_v27 }
  0x26   :  { %228 = vmatpush.msra.mxu1 %v195_v29  ;;  %367 = vmatpush.msra.mxu3 %v195_v29 }
  0x28   :  { %229 = vmatpush.msra.mxu1 %v194_v30  ;;  %368 = vmatpush.msra.mxu3 %v194_v30 }
  0x29   :  { %341 = vmatmul.msk.f32.gmra.mxu0 %vm64_vm0, %v46_v6 }
  0x31   :  { %342 = vmatmul.msk.f32.gmra.mxu0 %vm64_vm0, %v47_v7 }
  0x39   :  { %343 = vmatmul.msk.f32.gmra.mxu0 %vm64_vm0, %v48_v8 }
  0x41   :  { %344 = vmatmul.msk.f32.gmra.mxu0 %vm64_vm0, %v49_v9 }
  0x49   :  { %345 = vmatmul.msk.f32.gmra.mxu0 %vm64_vm0, %v50_v10 }
  0x51   :  { %346 = vmatmul.msk.f32.gmra.mxu0 %vm64_vm0, %v51_v14 }
  0x59   :  { %347 = vmatmul.msk.f32.gmra.mxu0 %vm64_vm0, %v52_v19 }
  0x61   :  { %348 = vmatmul.msk.f32.gmra.mxu0 %vm64_vm0, %v53_v24 }
  0x69   :  { %349 = vmatmul.msk.f32.gmra.mxu0 %vm64_vm0, %v54_v28 }
  0x71   :  { %350 = vmatmul.msk.f32.gmra.mxu0 %vm64_vm0, %v55_v31  ;;  %v372_v31 = vld [vmem:[%s604_s4] ss:$0 sm:$0xff] }
  0x79   :  { %351 = vmatmul.msk.f32.gmra.mxu0 %vm64_vm0, %v56_v32 }
  0x81   :  { %352 = vmatmul.msk.f32.gmra.mxu0 %vm64_vm0, %v57_v33 }
  0x86   :  { %v130_v35 = vpop.f32.mrf.mxu0 }
  0x87   :  { %v131_v36 = vadd.f32 %v371_v34, %v130_v35 }
  0x89   :  { %v178_v37 = vmax.f32 %v131_v36, 0.0 }
  0x8b   :  { %230 = vmatmul.f32.vlgmr.msra.gmra.mxu1 %v178_v37 }
  0x8e   :  { %v133_v38 = vpop.f32.mrf.mxu0 }
  0x8f   :  { %v134_v39 = vadd.f32 %v371_v34, %v133_v38 }
  0x91   :  { %v179_v40 = vmax.f32 %v134_v39, 0.0 }
  0x93   :  { %233 = vmatmul.f32.gmra.mxu1 %v179_v40 }
  0x96   :  { %v136_v41 = vpop.f32.mrf.mxu0 }
  0x97   :  { %v137_v42 = vadd.f32 %v371_v34, %v136_v41 }
  0x99   :  { %v180_v43 = vmax.f32 %v137_v42, 0.0 }
  0x9b   :  { %236 = vmatmul.f32.gmra.mxu1 %v180_v43 }
  0x9e   :  { %v139_v44 = vpop.f32.mrf.mxu0 }
  0x9f   :  { %v140_v45 = vadd.f32 %v371_v34, %v139_v44 }
  0xa1   :  { %v181_v46 = vmax.f32 %v140_v45, 0.0 }
  0xa3   :  { %239 = vmatmul.f32.gmra.mxu1 %v181_v46 }
  0xa6   :  { %v142_v47 = vpop.f32.mrf.mxu0 }
  0xa7   :  { %v143_v48 = vadd.f32 %v371_v34, %v142_v47 }
  0xa9   :  { %v182_v49 = vmax.f32 %v143_v48, 0.0 }
  0xab   :  { %242 = vmatmul.f32.gmra.mxu1 %v182_v49 }
  0xae   :  { %v145_v50 = vpop.f32.mrf.mxu0 }
  0xaf   :  { %v146_v51 = vadd.f32 %v371_v34, %v145_v50 }
  0xb1   :  { %v183_v52 = vmax.f32 %v146_v51, 0.0 }
  0xb3   :  { %245 = vmatmul.f32.gmra.mxu1 %v183_v52 }
  0xb6   :  { %v148_v53 = vpop.f32.mrf.mxu0 }
  0xb7   :  { %v149_v54 = vadd.f32 %v371_v34, %v148_v53 }
  0xb9   :  { %v184_v55 = vmax.f32 %v149_v54, 0.0 }
  0xbb   :  { %248 = vmatmul.f32.gmra.mxu1 %v184_v55 }
  0xbe   :  { %v151_v56 = vpop.f32.mrf.mxu0 }
  0xbf   :  { %v152_v57 = vadd.f32 %v371_v34, %v151_v56 }
  0xc1   :  { %v185_v58 = vmax.f32 %v152_v57, 0.0 }
  0xc3   :  { %251 = vmatmul.f32.gmra.mxu1 %v185_v58 }
  0xc6   :  { %v154_v59 = vpop.f32.mrf.mxu0 }
  0xc7   :  { %v155_v60 = vadd.f32 %v371_v34, %v154_v59 }
  0xc9   :  { %v186_v61 = vmax.f32 %v155_v60, 0.0 }
  0xcb   :  { %254 = vmatmul.f32.gmra.mxu1 %v186_v61 }
  0xce   :  { %v157_v62 = vpop.f32.mrf.mxu0 }
  0xcf   :  { %v158_v63 = vadd.f32 %v371_v34, %v157_v62 }
  0xd1   :  { %v187_v0 = vmax.f32 %v158_v63, 0.0 }
  0xd3   :  { %257 = vmatmul.f32.vlgmr.msra.gmra.mxu3 %v187_v0 }
  0xd6   :  { %v160_v1 = vpop.f32.mrf.mxu0 }
  0xd7   :  { %v161_v2 = vadd.f32 %v371_v34, %v160_v1 }
  0xd9   :  { %v188_v3 = vmax.f32 %v161_v2, 0.0 }
  0xdb   :  { %260 = vmatmul.f32.gmra.mxu3 %v188_v3 }
  0xde   :  { %v163_v4 = vpop.f32.mrf.mxu0 }
  0xdf   :  { %v164_v5 = vadd.f32 %v371_v34, %v163_v4  ;;  %v295_v4 = vld [vmem:[#allocation3] sm:$0xff] }
  0xe1   :  { %v189_v6 = vmax.f32 %v164_v5, 0.0  ;;  %v317_v5 = vstv %s606_s6 }
  0xe3   :  { %263 = vmatmul.f32.gmra.mxu3 %v189_v6 }
  0xe6   :  { %v166_v7 = vpop.f32.mrf.mxu0 }
  0xe7   :  { %v167_v8 = vadd.f32 %v371_v34, %v166_v7 }
  0xe9   :  { %v190_v9 = vmax.f32 %v167_v8, 0.0 }
  0xeb   :  { %266 = vmatmul.f32.gmra.mxu3 %v190_v9 }
  0xee   :  { %v169_v10 = vpop.f32.mrf.mxu0 }
  0xef   :  { %v170_v11 = vadd.f32 %v371_v34, %v169_v10 }
  0xf1   :  { %v191_v12 = vmax.f32 %v170_v11, 0.0 }
  0xf3   :  { %269 = vmatmul.f32.gmra.mxu3 %v191_v12 }
  0xf6   :  { %v172_v13 = vpop.f32.mrf.mxu0 }
  0xf7   :  { %v173_v14 = vadd.f32 %v371_v34, %v172_v13 }
  0xf9   :  { %v192_v15 = vmax.f32 %v173_v14, 0.0 }
  0xfb   :  { %272 = vmatmul.f32.gmra.mxu3 %v192_v15 }
  0xfe   :  { %v175_v16 = vpop.f32.mrf.mxu0 }
  0xff   :  { %v176_v17 = vadd.f32 %v371_v34, %v175_v16 }
 0x101   :  { %v193_v18 = vmax.f32 %v176_v17, 0.0 }
 0x103   :  { %275 = vmatmul.f32.gmra.mxu3 %v193_v18 }
 0x108   :  { %v231_v19 = vpop.f32.mrf.mxu1 }
 0x109   :  { %v232_v1 = vadd.f32 %v372_v31, %v231_v19 }
 0x10b   :  { %v279_v3 = vmax.f32 %v232_v1, 0.0 }
 0x110   :  { %v234_v21 = vpop.f32.mrf.mxu1 }
 0x111   :  { %v235_v63 = vadd.f32 %v372_v31, %v234_v21 }
 0x113   :  { %v280_v2 = vmax.f32 %v235_v63, 0.0 }
 0x118   :  { %v237_v23 = vpop.f32.mrf.mxu1 }
 0x119   :  { %v238_v61 = vadd.f32 %v372_v31, %v237_v23 }
 0x11b   :  { %v281_v0 = vmax.f32 %v238_v61, 0.0 }
 0x120   :  { %v240_v25 = vpop.f32.mrf.mxu1 }
 0x121   :  { %v241_v59 = vadd.f32 %v372_v31, %v240_v25 }
 0x123   :  { %v282_v62 = vmax.f32 %v241_v59, 0.0 }
 0x128   :  { %v243_v27 = vpop.f32.mrf.mxu1 }
 0x129   :  { %v244_v57 = vadd.f32 %v372_v31, %v243_v27 }
 0x12b   :  { %v283_v60 = vmax.f32 %v244_v57, 0.0 }
 0x130   :  { %v246_v30 = vpop.f32.mrf.mxu1 }
 0x131   :  { %v247_v55 = vadd.f32 %v372_v31, %v246_v30 }
 0x133   :  { %v284_v58 = vmax.f32 %v247_v55, 0.0 }
 0x138   :  { %v249_v36 = vpop.f32.mrf.mxu1 }
 0x139   :  { %v250_v53 = vadd.f32 %v372_v31, %v249_v36 }
 0x13b   :  { %v285_v56 = vmax.f32 %v250_v53, 0.0 }
 0x140   :  { %v252_v41 = vpop.f32.mrf.mxu1 }
 0x141   :  { %v253_v51 = vadd.f32 %v372_v31, %v252_v41 }
 0x143   :  { %v286_v54 = vmax.f32 %v253_v51, 0.0 }
 0x148   :  { %v255_v48 = vpop.f32.mrf.mxu1 }
 0x149   :  { %v256_v49 = vadd.f32 %v372_v31, %v255_v48 }
 0x14b   :  { %v287_v52 = vmax.f32 %v256_v49, 0.0 }
 0x156   :  { %v258_v20 = vpop.f32.mrf.mxu3 }
 0x157   :  { %v259_v46 = vadd.f32 %v372_v31, %v258_v20 }
 0x159   :  { %v288_v50 = vmax.f32 %v259_v46, 0.0 }
 0x15e   :  { %v261_v22 = vpop.f32.mrf.mxu3 }
 0x15f   :  { %v262_v44 = vadd.f32 %v372_v31, %v261_v22 }
 0x161   :  { %v289_v47 = vmax.f32 %v262_v44, 0.0 }
 0x166   :  { %v264_v24 = vpop.f32.mrf.mxu3 }
 0x167   :  { %v265_v42 = vadd.f32 %v372_v31, %v264_v24 }
 0x169   :  { %v290_v45 = vmax.f32 %v265_v42, 0.0 }
 0x16e   :  { %v267_v26 = vpop.f32.mrf.mxu3 }
 0x16f   :  { %v268_v39 = vadd.f32 %v372_v31, %v267_v26 }
 0x171   :  { %v291_v43 = vmax.f32 %v268_v39, 0.0 }
 0x176   :  { %v270_v28 = vpop.f32.mrf.mxu3 }
 0x177   :  { %v271_v37 = vadd.f32 %v372_v31, %v270_v28 }
 0x179   :  { %v292_v40 = vmax.f32 %v271_v37, 0.0 }
 0x17e   :  { %v273_v29 = vpop.f32.mrf.mxu3 }
 0x17f   :  { %v274_v34 = vadd.f32 %v372_v31, %v273_v29 }
 0x181   :  { %v293_v38 = vmax.f32 %v274_v34, 0.0 }
 0x186   :  { %v276_v32 = vpop.f32.mrf.mxu3 }
 0x187   :  { %v277_v33 = vadd.f32 %v372_v31, %v276_v32 }
 0x189   :  { %v294_v35 = vmax.f32 %v277_v33, 0.0 }
 0x18b   :  { %296 = vmatpush.xpose.msra.mxu2 %v294_v35 }
 0x18f   :  { %297 = vmatpush.xpose.msra.mxu2 %v293_v38 }
 0x193   :  { %298 = vmatpush.xpose.msra.mxu2 %v292_v40 }
 0x197   :  { %299 = vmatpush.xpose.msra.mxu2 %v291_v43 }
 0x19b   :  { %300 = vmatpush.xpose.msra.mxu2 %v290_v45 }
 0x19f   :  { %301 = vmatpush.xpose.msra.mxu2 %v289_v47 }
 0x1a3   :  { %302 = vmatpush.xpose.msra.mxu2 %v288_v50 }
 0x1a7   :  { %303 = vmatpush.xpose.msra.mxu2 %v287_v52 }
 0x1ab   :  { %304 = vmatpush.xpose.msra.mxu2 %v286_v54 }
 0x1af   :  { %305 = vmatpush.xpose.msra.mxu2 %v285_v56 }
 0x1b3   :  { %306 = vmatpush.xpose.msra.mxu2 %v284_v58 }
 0x1b7   :  { %307 = vmatpush.xpose.msra.mxu2 %v283_v60 }
 0x1bb   :  { %308 = vmatpush.xpose.msra.mxu2 %v282_v62 }
 0x1bf   :  { %309 = vmatpush.xpose.msra.mxu2 %v281_v0 }
 0x1c3   :  { %310 = vmatpush.xpose.msra.mxu2 %v280_v2 }
 0x1c7   :  { %311 = vmatpush.xpose.msra.mxu2 %v279_v3 }
 0x1ca   :  { %312 = vmatmul.f32.vlgmr.msra.gmra.mxu2 %v295_v4 }
 0x24d   :  { %v313_v6 = vpop.f32.mrf.mxu2 }
 0x24e   :  { %v318_v7 = vadd.f32 %v317_v5, %v313_v6 }
 0x250   :  { %319 = vst [vmem:[#allocation6] sm:$0x1] %v318_v7 }
 0x251   :  { %330 = dma.vmem_to_hbm [thread:$0]  %s326_s25, 16, %s328_s28, [#allocation5]  }
 0x252   :  { %423 = dma.done.wait [#allocation5], 16  }
 0x253   :  { %424 = vsyncadd [#allocation5], 4294967280 }
 0x254   :  { %335 = vsyncpa [#allocation4], 1 }
 0x255   :  { %336 = vsyncpa [#allocation5], 1 }

</bundles_post_ra>
